<compile_context>
chip_gen: v7x
topology: tpu7x:2x2x1
jax: 0.10.0
libtpu: 0.0.40
codegen_flags: <defaults>
</compile_context>

<pallas_src>
import jax
import jax.numpy as jnp
from jax.experimental import pallas as pl
from jax.experimental.pallas import tpu as pltpu

NEG_SLOPE = 0.01  # nn.LeakyReLU default


def _round_up(x, m):
    return (x + m - 1) // m * m


# ----------------------------- fused Pallas kernel ----------------------------- #

def _make_fc_kernel(n_hidden):
    """Kernel over one batch tile: runs all hidden layers + final linear in VMEM."""

    def kernel(*refs):
        x_ref = refs[0]
        o_ref = refs[-1]
        prefs = refs[1:-1]  # [w0, b0, w1, b1, ..., w_{n-1}, b_{n-1}, wf, bf]

        h = x_ref[...].astype(jnp.bfloat16)  # bf16 operand for the MXU
        for l in range(n_hidden):
            w_ref = prefs[2 * l]
            b_ref = prefs[2 * l + 1]           # (1, D) folded bias (BN already in W/b)
            z = jnp.dot(h, w_ref[...], preferred_element_type=jnp.float32) + b_ref[...]
            # LeakyReLU in f32, single downcast for the next matmul.
            h = jnp.maximum(z, NEG_SLOPE * z).astype(jnp.bfloat16)

        wf_ref = prefs[-2]
        bf_ref = prefs[-1]
        z = jnp.dot(h, wf_ref[...], preferred_element_type=jnp.float32) + bf_ref[...]
        o_ref[...] = z.astype(o_ref.dtype)

    return kernel


def fc_forward(x, packed_hidden, packed_final, n_tasks):
    """Run the fused FC head. packed_* come from pack_fc_params."""
    n_hidden = len(packed_hidden)
    B, Din = x.shape
    Din_pad = packed_hidden[0][0].shape[0]   # padded input width (multiple of 128)
    D_h = packed_hidden[0][0].shape[1]       # padded hidden width (multiple of 128)
    N_pad = packed_final[0].shape[1]         # padded output width (multiple of 128)

    # Batch tiling: TM rows per grid step (multiple of 16 for bf16 sublane packing).
    TM = min(_round_up(B, 16), 512)
    B_pad = _round_up(B, TM)
    if B > 16 and B_pad // TM < 2:
        # v7x has 2 TensorCores: make sure the "parallel" grid has >= 2 tiles.
        TM = max(16, _round_up((B + 1) // 2, 16))
        B_pad = _round_up(B, TM)
    pad_rows, pad_cols = B_pad - B, Din_pad - Din
    if pad_rows or pad_cols:
        x = jnp.pad(x, ((0, pad_rows), (0, pad_cols)))
    grid = (B_pad // TM,)

    in_specs = [pl.BlockSpec((TM, Din_pad), lambda i: (i, 0))]
    args = [x]
    for (w, b) in packed_hidden:
        in_specs.append(pl.BlockSpec(w.shape, lambda i: (0, 0)))    # VMEM-resident
        in_specs.append(pl.BlockSpec(b.shape, lambda i: (0, 0)))
        args.extend([w, b])
    wf, bf = packed_final
    in_specs.append(pl.BlockSpec(wf.shape, lambda i: (0, 0)))
    in_specs.append(pl.BlockSpec(bf.shape, lambda i: (0, 0)))
    args.extend([wf, bf])

    # Cost estimate (scheduler hint) + explicit VMEM budget for resident weights.
    flops = 2 * B_pad * (Din_pad * D_h + (n_hidden - 1) * D_h * D_h + D_h * N_pad)
    weight_bytes = sum(int(a.size) * a.dtype.itemsize for a in args[1:])
    bytes_accessed = int(x.size) * x.dtype.itemsize + weight_bytes + B_pad * N_pad * 2
    tile_bytes = 2 * TM * Din_pad * x.dtype.itemsize + 2 * TM * N_pad * 2  # dbl-buffered io
    vmem_limit = int(min(max(2 * weight_bytes + tile_bytes + (2 << 20), 16 << 20), 64 << 20))

    out = pl.pallas_call(
        _make_fc_kernel(n_hidden),
        out_shape=jax.ShapeDtypeStruct((B_pad, N_pad), jnp.bfloat16),
        grid=grid,
        in_specs=in_specs,
        out_specs=pl.BlockSpec((TM, N_pad), lambda i: (i, 0)),
        compiler_params=pltpu.CompilerParams(
            dimension_semantics=("parallel",),
            vmem_limit_bytes=vmem_limit,
        ),
        cost_estimate=pl.CostEstimate(flops=flops, transcendentals=0,
                                      bytes_accessed=bytes_accessed),
    )(*args)
    return out[:B, :n_tasks].astype(jnp.float32)


# --------------------------- parameter construction ---------------------------- #

def _linear_init(key, din, dout):
    kw, kb = jax.random.split(key)
    bound = 1.0 / (din ** 0.5)
    # stored as (Din, Dout) == PyTorch W.T so the kernel does x @ W
    w = jax.random.uniform(kw, (din, dout), jnp.float32, -bound, bound)
    b = jax.random.uniform(kb, (1, dout), jnp.float32, -bound, bound)
    return w, b


def _bn_init(key, d, eps=1e-5):
    kg, kb = jax.random.split(key)
    gamma = 1.0 + 0.1 * jax.random.normal(kg, (1, d), jnp.float32)
    beta = 0.1 * jax.random.normal(kb, (1, d), jnp.float32)
    running_mean = jnp.zeros((1, d), jnp.float32)
    running_var = jnp.ones((1, d), jnp.float32)
    s = gamma / jnp.sqrt(running_var + eps)
    t = beta - running_mean * s
    return s, t


def build_fc_params(key, d_graph_layer, d_FC_layer, n_FC_layer, n_tasks):
    """Mirror the PyTorch FC.__init__ ModuleList construction order (f32 params)."""
    hidden = []   # list of (w, b, s, t) fused Linear->LeakyReLU->BN blocks
    final = None  # (w, b)
    keys = iter(jax.random.split(key, 4 * n_FC_layer + 8))
    for j in range(n_FC_layer):
        if j == 0:
            w, b = _linear_init(next(keys), d_graph_layer, d_FC_layer)
            s, t = _bn_init(next(keys), d_FC_layer)
            hidden.append((w, b, s, t))
        if j == n_FC_layer - 1:
            final = _linear_init(next(keys), d_FC_layer, n_tasks)
        else:
            w, b = _linear_init(next(keys), d_FC_layer, d_FC_layer)
            s, t = _bn_init(next(keys), d_FC_layer)
            hidden.append((w, b, s, t))
    return hidden, final


def pack_fc_params(hidden, final, d_graph_layer, n_tasks):
    """Fold eval-mode BN into the following Linear (f32), pad feature dims to lane
    multiples (exact zero pads), then cast weights to bf16."""
    D_FC = hidden[0][0].shape[1]
    Din_pad = _round_up(d_graph_layer, 128)
    D_h = _round_up(D_FC, 128)
    N_pad = _round_up(n_tasks, 128)

    # ---- BN fold, all in f32 before any bf16 cast ----
    folded = []
    prev_s, prev_t = None, None
    for (w, b, s, t) in hidden:
        if prev_s is not None:
            b = b + prev_t @ w
            w = prev_s[0][:, None] * w
        folded.append((w, b))
        prev_s, prev_t = s, t
    wf, bf = final
    bf = bf + prev_t @ wf
    wf = prev_s[0][:, None] * wf

    # ---- pad + cast ----
    packed_hidden = []
    for idx, (w, b) in enumerate(folded):
        din, dout = w.shape
        din_pad = Din_pad if idx == 0 else D_h
        w_p = jnp.zeros((din_pad, D_h), jnp.float32).at[:din, :dout].set(w)
        b_p = jnp.zeros((1, D_h), jnp.float32).at[:, :dout].set(b[0])
        packed_hidden.append((w_p.astype(jnp.bfloat16), b_p))

    dinf, doutf = wf.shape
    wf_p = jnp.zeros((D_h, N_pad), jnp.float32).at[:dinf, :doutf].set(wf)
    bf_p = jnp.zeros((1, N_pad), jnp.float32).at[:, :doutf].set(bf[0])
    return packed_hidden, (wf_p.astype(jnp.bfloat16), bf_p)


# --------------------------------- references ----------------------------------- #

def fc_forward_eval_ref(h, hidden, final):
    """Pure f32 eval-mode PyTorch semantics: Linear -> (dropout=id) -> LeakyReLU -> BN."""
    for (w, b, s, t) in hidden:
        z = h @ w + b
        a = jnp.where(z > 0, z, NEG_SLOPE * z)
        h = a * s + t
    w, b = final
    return h @ w + b


def fc_forward_mirror_ref(x, packed_hidden, packed_final, n_tasks):
    """Pure-JAX mirror of the kernel numerics (folded params, bf16 matmul, f32 acc)."""
    Din_pad = packed_hidden[0][0].shape[0]
    h = jnp.pad(x, ((0, 0), (0, Din_pad - x.shape[1]))).astype(jnp.bfloat16)
    for (w, b) in packed_hidden:
        z = jnp.dot(h, w, preferred_element_type=jnp.float32) + b
        h = jnp.maximum(z, NEG_SLOPE * z).astype(jnp.bfloat16)
    w, b = packed_final
    z = jnp.dot(h, w, preferred_element_type=jnp.float32) + b
    return z.astype(jnp.bfloat16).astype(jnp.float32)[:, :n_tasks]


# ------------------------------------ main -------------------------------------- #

if __name__ == "__main__":
    # Small, forward-consistent shapes.
    B = 8               # batch
    d_graph_layer = 32  # input feature dim
    d_FC_layer = 64     # hidden dim
    n_FC_layer = 3      # number of FC "layers" (module-list construction as in PyTorch)
    n_tasks = 2         # output dim
    dropout = 0.1       # unused at eval time (identity)

    key = jax.random.PRNGKey(0)
    k_in, k_params = jax.random.split(key)

    h = jax.random.normal(k_in, (B, d_graph_layer), jnp.float32)
    hidden, final = build_fc_params(k_params, d_graph_layer, d_FC_layer,
                                    n_FC_layer, n_tasks)
    packed_hidden, packed_final = pack_fc_params(hidden, final, d_graph_layer, n_tasks)

    out = fc_forward(h, packed_hidden, packed_final, n_tasks)
    out = jax.block_until_ready(out)
    assert out.shape == (B, n_tasks), out.shape

    ref_mirror = fc_forward_mirror_ref(h, packed_hidden, packed_final, n_tasks)
    ref_eval = fc_forward_eval_ref(h, hidden, final)
    assert jnp.allclose(out, ref_mirror, atol=2e-2, rtol=2e-2), "mismatch vs kernel mirror"
    assert jnp.allclose(out, ref_eval, atol=5e-2, rtol=5e-2), "mismatch vs eval semantics"

    print("KERNEL_OK")
</pallas_src>

<mosaic_0001>
module attributes {stable_mosaic.version = 11 : i64} {
  func.func @kernel(%arg0: i32, %arg1: memref<16x128xf32, #tpu.memory_space<vmem>>, %arg2: memref<128x128xbf16, #tpu.memory_space<vmem>>, %arg3: memref<1x128xf32, #tpu.memory_space<vmem>>, %arg4: memref<128x128xbf16, #tpu.memory_space<vmem>>, %arg5: memref<1x128xf32, #tpu.memory_space<vmem>>, %arg6: memref<128x128xbf16, #tpu.memory_space<vmem>>, %arg7: memref<1x128xf32, #tpu.memory_space<vmem>>, %arg8: memref<128x128xbf16, #tpu.memory_space<vmem>>, %arg9: memref<1x128xf32, #tpu.memory_space<vmem>>, %arg10: memref<16x128xbf16, #tpu.memory_space<vmem>>) attributes {dimension_semantics = [#tpu.dimension_semantics<parallel>], iteration_bounds = array<i64: 1>, scalar_prefetch = 0 : i64, scratch_operands = 0 : i64, tpu.core_type = #tpu.core_type<tc>, window_params = [{transform_indices = @transform_0, window_bounds = array<i64: 16, 128>}, {pipeline_mode = #tpu.pipeline_mode<synchronous>, transform_indices = @transform_1, window_bounds = array<i64: 128, 128>}, {pipeline_mode = #tpu.pipeline_mode<synchronous>, transform_indices = @transform_2, window_bounds = array<i64: 1, 128>}, {pipeline_mode = #tpu.pipeline_mode<synchronous>, transform_indices = @transform_3, window_bounds = array<i64: 128, 128>}, {pipeline_mode = #tpu.pipeline_mode<synchronous>, transform_indices = @transform_4, window_bounds = array<i64: 1, 128>}, {pipeline_mode = #tpu.pipeline_mode<synchronous>, transform_indices = @transform_5, window_bounds = array<i64: 128, 128>}, {pipeline_mode = #tpu.pipeline_mode<synchronous>, transform_indices = @transform_6, window_bounds = array<i64: 1, 128>}, {pipeline_mode = #tpu.pipeline_mode<synchronous>, transform_indices = @transform_7, window_bounds = array<i64: 128, 128>}, {pipeline_mode = #tpu.pipeline_mode<synchronous>, transform_indices = @transform_8, window_bounds = array<i64: 1, 128>}, {transform_indices = @transform_9, window_bounds = array<i64: 16, 128>}]} {
    %c0 = arith.constant 0 : index
    %c0_0 = arith.constant 0 : index
    %0 = vector.load %arg1[%c0, %c0_0] : memref<16x128xf32, #tpu.memory_space<vmem>>, vector<16x128xf32>
    %1 = arith.truncf %0 : vector<16x128xf32> to vector<16x128xbf16>
    %c0_1 = arith.constant 0 : index
    %c0_2 = arith.constant 0 : index
    %2 = vector.load %arg2[%c0_1, %c0_2] : memref<128x128xbf16, #tpu.memory_space<vmem>>, vector<128x128xbf16>
    %cst = arith.constant dense<0.000000e+00> : vector<16x128xf32>
    %3 = tpu.matmul %1, %2, %cst {dimension_numbers = #tpu.dot_dimension_numbers<[1], [0], [0], [1], [0, 0, 1, 1], [], []>} : vector<16x128xbf16>, vector<128x128xbf16>, vector<16x128xf32> -> vector<16x128xf32>
    %c0_3 = arith.constant 0 : index
    %c0_4 = arith.constant 0 : index
    %4 = vector.load %arg3[%c0_3, %c0_4] : memref<1x128xf32, #tpu.memory_space<vmem>>, vector<1x128xf32>
    %5 = vector.broadcast %4 : vector<1x128xf32> to vector<16x128xf32>
    %6 = arith.addf %3, %5 : vector<16x128xf32>
    %cst_5 = arith.constant 0.00999999977 : f32
    %7 = vector.broadcast %cst_5 : f32 to vector<16x128xf32>
    %8 = arith.mulf %7, %6 : vector<16x128xf32>
    %9 = arith.maximumf %6, %8 : vector<16x128xf32>
    %10 = arith.truncf %9 : vector<16x128xf32> to vector<16x128xbf16>
    %c0_6 = arith.constant 0 : index
    %c0_7 = arith.constant 0 : index
    %11 = vector.load %arg4[%c0_6, %c0_7] : memref<128x128xbf16, #tpu.memory_space<vmem>>, vector<128x128xbf16>
    %cst_8 = arith.constant dense<0.000000e+00> : vector<16x128xf32>
    %12 = tpu.matmul %10, %11, %cst_8 {dimension_numbers = #tpu.dot_dimension_numbers<[1], [0], [0], [1], [0, 0, 1, 1], [], []>} : vector<16x128xbf16>, vector<128x128xbf16>, vector<16x128xf32> -> vector<16x128xf32>
    %c0_9 = arith.constant 0 : index
    %c0_10 = arith.constant 0 : index
    %13 = vector.load %arg5[%c0_9, %c0_10] : memref<1x128xf32, #tpu.memory_space<vmem>>, vector<1x128xf32>
    %14 = vector.broadcast %13 : vector<1x128xf32> to vector<16x128xf32>
    %15 = arith.addf %12, %14 : vector<16x128xf32>
    %cst_11 = arith.constant 0.00999999977 : f32
    %16 = vector.broadcast %cst_11 : f32 to vector<16x128xf32>
    %17 = arith.mulf %16, %15 : vector<16x128xf32>
    %18 = arith.maximumf %15, %17 : vector<16x128xf32>
    %19 = arith.truncf %18 : vector<16x128xf32> to vector<16x128xbf16>
    %c0_12 = arith.constant 0 : index
    %c0_13 = arith.constant 0 : index
    %20 = vector.load %arg6[%c0_12, %c0_13] : memref<128x128xbf16, #tpu.memory_space<vmem>>, vector<128x128xbf16>
    %cst_14 = arith.constant dense<0.000000e+00> : vector<16x128xf32>
    %21 = tpu.matmul %19, %20, %cst_14 {dimension_numbers = #tpu.dot_dimension_numbers<[1], [0], [0], [1], [0, 0, 1, 1], [], []>} : vector<16x128xbf16>, vector<128x128xbf16>, vector<16x128xf32> -> vector<16x128xf32>
    %c0_15 = arith.constant 0 : index
    %c0_16 = arith.constant 0 : index
    %22 = vector.load %arg7[%c0_15, %c0_16] : memref<1x128xf32, #tpu.memory_space<vmem>>, vector<1x128xf32>
    %23 = vector.broadcast %22 : vector<1x128xf32> to vector<16x128xf32>
    %24 = arith.addf %21, %23 : vector<16x128xf32>
    %cst_17 = arith.constant 0.00999999977 : f32
    %25 = vector.broadcast %cst_17 : f32 to vector<16x128xf32>
    %26 = arith.mulf %25, %24 : vector<16x128xf32>
    %27 = arith.maximumf %24, %26 : vector<16x128xf32>
    %28 = arith.truncf %27 : vector<16x128xf32> to vector<16x128xbf16>
    %c0_18 = arith.constant 0 : index
    %c0_19 = arith.constant 0 : index
    %29 = vector.load %arg8[%c0_18, %c0_19] : memref<128x128xbf16, #tpu.memory_space<vmem>>, vector<128x128xbf16>
    %cst_20 = arith.constant dense<0.000000e+00> : vector<16x128xf32>
    %30 = tpu.matmul %28, %29, %cst_20 {dimension_numbers = #tpu.dot_dimension_numbers<[1], [0], [0], [1], [0, 0, 1, 1], [], []>} : vector<16x128xbf16>, vector<128x128xbf16>, vector<16x128xf32> -> vector<16x128xf32>
    %c0_21 = arith.constant 0 : index
    %c0_22 = arith.constant 0 : index
    %31 = vector.load %arg9[%c0_21, %c0_22] : memref<1x128xf32, #tpu.memory_space<vmem>>, vector<1x128xf32>
    %32 = vector.broadcast %31 : vector<1x128xf32> to vector<16x128xf32>
    %33 = arith.addf %30, %32 : vector<16x128xf32>
    %34 = arith.truncf %33 : vector<16x128xf32> to vector<16x128xbf16>
    %c0_23 = arith.constant 0 : index
    %c0_24 = arith.constant 0 : index
    %35 = vector.load %arg10[%c0_23, %c0_24] : memref<16x128xbf16, #tpu.memory_space<vmem>>, vector<16x128xbf16>
    tpu.vector_store %arg10[%c0_23, %c0_24], %34 {strides = array<i32>} : memref<16x128xbf16, #tpu.memory_space<vmem>>, vector<16x128xbf16>,
    return
  }
  func.func @transform_0(%arg0: i32) -> (i32, i32) {
    %c0_i32 = arith.constant 0 : i32
    %c0_i32_0 = arith.constant 0 : i32
    return %arg0, %c0_i32 : i32, i32
  }
  func.func @transform_1(%arg0: i32) -> (i32, i32) {
    %c0_i32 = arith.constant 0 : i32
    %c0_i32_0 = arith.constant 0 : i32
    %c0_i32_1 = arith.constant 0 : i32
    return %c0_i32, %c0_i32_0 : i32, i32
  }
  func.func @transform_2(%arg0: i32) -> (i32, i32) {
    %c0_i32 = arith.constant 0 : i32
    %c0_i32_0 = arith.constant 0 : i32
    %c0_i32_1 = arith.constant 0 : i32
    return %c0_i32, %c0_i32_0 : i32, i32
  }
  func.func @transform_3(%arg0: i32) -> (i32, i32) {
    %c0_i32 = arith.constant 0 : i32
    %c0_i32_0 = arith.constant 0 : i32
    %c0_i32_1 = arith.constant 0 : i32
    return %c0_i32, %c0_i32_0 : i32, i32
  }
  func.func @transform_4(%arg0: i32) -> (i32, i32) {
    %c0_i32 = arith.constant 0 : i32
    %c0_i32_0 = arith.constant 0 : i32
    %c0_i32_1 = arith.constant 0 : i32
    return %c0_i32, %c0_i32_0 : i32, i32
  }
  func.func @transform_5(%arg0: i32) -> (i32, i32) {
    %c0_i32 = arith.constant 0 : i32
    %c0_i32_0 = arith.constant 0 : i32
    %c0_i32_1 = arith.constant 0 : i32
    return %c0_i32, %c0_i32_0 : i32, i32
  }
  func.func @transform_6(%arg0: i32) -> (i32, i32) {
    %c0_i32 = arith.constant 0 : i32
    %c0_i32_0 = arith.constant 0 : i32
    %c0_i32_1 = arith.constant 0 : i32
    return %c0_i32, %c0_i32_0 : i32, i32
  }
  func.func @transform_7(%arg0: i32) -> (i32, i32) {
    %c0_i32 = arith.constant 0 : i32
    %c0_i32_0 = arith.constant 0 : i32
    %c0_i32_1 = arith.constant 0 : i32
    return %c0_i32, %c0_i32_0 : i32, i32
  }
  func.func @transform_8(%arg0: i32) -> (i32, i32) {
    %c0_i32 = arith.constant 0 : i32
    %c0_i32_0 = arith.constant 0 : i32
    %c0_i32_1 = arith.constant 0 : i32
    return %c0_i32, %c0_i32_0 : i32, i32
  }
  func.func @transform_9(%arg0: i32) -> (i32, i32) {
    %c0_i32 = arith.constant 0 : i32
    %c0_i32_0 = arith.constant 0 : i32
    return %arg0, %c0_i32 : i32, i32
  }
}

</mosaic_0001>

<bundles_post_ra>
// kernel: tpu_custom_call.1
= control target key start
LH: loop header
LB: loop body
LE: loop exit
PB: predicated region body
PF: predicated region fallthrough
CT: control target
= control target key end

     0   :  { %14 = vsyncpa [#allocation3], 0  ;;  %s1143_s0 = inlined_call_operand.hbm [shape: f32[16,128], index: 0, kind: input, shape index: {}]   ;;  %s1144_s1 = inlined_call_operand.hbm [shape: bf16[128,128], index: 1, kind: input, shape index: {}]   ;;  %s1145_s2 = inlined_call_operand.vmem [shape: f32[1,128], index: 2, kind: input, shape index: {}]   ;;  %s1146_s3 = inlined_call_operand.hbm [shape: bf16[128,128], index: 3, kind: input, shape index: {}]   ;;  %s1147_s4 = inlined_call_operand.vmem [shape: f32[1,128], index: 4, kind: input, shape index: {}]   ;;  %s1148_s5 = inlined_call_operand.hbm [shape: bf16[128,128], index: 5, kind: input, shape index: {}]   ;;  %s1149_s6 = inlined_call_operand.vmem [shape: f32[1,128], index: 6, kind: input, shape index: {}]   ;;  %s1150_s7 = inlined_call_operand.hbm [shape: bf16[128,128], index: 7, kind: input, shape index: {}]   ;;  %s1151_s8 = inlined_call_operand.vmem [shape: f32[1,128], index: 8, kind: input, shape index: {}]   ;;  %s1152_s9 = inlined_call_operand.hbm [shape: bf16[16,128], index: 9, kind: output, shape index: {}]  }
   0x1   :  { %15 = vsyncpa [#allocation6], 0 }
   0x2   :  { %16 = vsyncpa [#allocation9], 0 }
   0x3   :  { %17 = vsyncpa [#allocation4], 0  ;;  %s942_s30 = smov [#allocation5]   ;;  %s802_s13 = scalar_lea.hbm %s1144_s1, 1024 }
   0x4   :  { %s35_s10 = sshll.u32 %s942_s30, 4  ;;  %p803_p0 = scmp.ne.s32.totalorder %s1144_s1, %s802_s13  ;;  %s36_s10 = int_to_ptr.vmem [resolvable:$true] %s35_s10 }
   0x5   :  { %p806_p1 = scmp.lt.u32.totalorder %s802_s13, %s1144_s1 }
   0x7   :  { %p808_p2 = pnand %p806_p1, %p803_p0 }
   0x9   :  { %811 = shalt.err (!%p808_p2)
}
   0xa   :  { %s812_s18 = scalar_lea.vmem %s36_s10, 1024  ;;  %p817_p4 = scmp.lt.s32.totalorder %s36_s10, %s36_s10 }
   0xb   :  { %p813_p3 = scmp.ne.s32.totalorder %s36_s10, %s812_s18  ;;  %p818_p5 = scmp.lt.s32.totalorder %s812_s18, %s812_s18 }
   0xd   :  { %p819_p6 = por %p818_p5, %p817_p4 }
   0xf   :  { %p820_p7 = pnand %p819_p6, %p813_p3 }
  0x11   :  { %823 = shalt.err (!%p820_p7)
}
  0x12   :  { %s943_s19 = smov 64   ;;  %s944_s20 = smov 4  }
  0x13   :  { %41 = dma.hbm_to_vmem [thread:$0]  %s1144_s1, 1024, %s36_s10, [#allocation6], %s943_s19, %s943_s19, %s944_s20  }
  0x14   :  { %s945_s23 = smov [#allocation8]   ;;  %s946_s25 = smov [#allocation2]  }
  0x15   :  { %s63_s24 = sshll.u32 %s945_s23, 4  ;;  %s23_s26 = sshll.u32 %s946_s25, 4  ;;  %s64_s24 = int_to_ptr.vmem [resolvable:$true] %s63_s24  ;;  %s24_s26 = int_to_ptr.vmem [resolvable:$true] %s23_s26 }
  0x16   :  { %s824_s29 = scalar_lea.hbm %s1148_s5, 1024 }
  0x17   :  { %p825_p8 = scmp.ne.s32.totalorder %s1148_s5, %s824_s29  ;;  %p828_p9 = scmp.lt.u32.totalorder %s824_s29, %s1148_s5 }
  0x19   :  { %p830_p10 = pnand %p828_p9, %p825_p8 }
  0x1b   :  { %833 = shalt.err (!%p830_p10)
}
  0x1c   :  { %s834_s1 = scalar_lea.vmem %s64_s24, 1024  ;;  %p839_p12 = scmp.lt.s32.totalorder %s64_s24, %s64_s24 }
  0x1d   :  { %p835_p11 = scmp.ne.s32.totalorder %s64_s24, %s834_s1  ;;  %p840_p13 = scmp.lt.s32.totalorder %s834_s1, %s834_s1 }
  0x1f   :  { %p841_p0 = por %p840_p13, %p839_p12 }
  0x21   :  { %p842_p1 = pnand %p841_p0, %p835_p11 }
  0x23   :  { %845 = shalt.err (!%p842_p1)
}
  0x24   :  { %69 = dma.hbm_to_vmem [thread:$0]  %s1148_s5, 1024, %s64_s24, [#allocation9], %s943_s19, %s943_s19, %s944_s20  }
  0x25   :  { %s846_s17 = scalar_lea.hbm %s1143_s0, 256 }
  0x26   :  { %p847_p2 = scmp.ne.s32.totalorder %s1143_s0, %s846_s17  ;;  %p850_p3 = scmp.lt.u32.totalorder %s846_s17, %s1143_s0 }
  0x28   :  { %p852_p4 = pnand %p850_p3, %p847_p2 }
  0x2a   :  { %855 = shalt.err (!%p852_p4)
}
  0x2b   :  { %s856_s25 = scalar_lea.vmem %s24_s26, 256  ;;  %p861_p6 = scmp.lt.s32.totalorder %s24_s26, %s24_s26 }
  0x2c   :  { %p857_p5 = scmp.ne.s32.totalorder %s24_s26, %s856_s25  ;;  %p862_p7 = scmp.lt.s32.totalorder %s856_s25, %s856_s25 }
  0x2e   :  { %p863_p8 = por %p862_p7, %p861_p6 }
  0x30   :  { %p864_p9 = pnand %p863_p8, %p857_p5 }
  0x32   :  { %867 = shalt.err (!%p864_p9)
}
  0x33   :  { %s947_s5 = smov 128   ;;  %s948_s24 = smov 8  }
  0x34   :  { %29 = dma.hbm_to_vmem [thread:$0]  %s1143_s0, 256, %s24_s26, [#allocation3], %s947_s5, %s947_s5, %s948_s24  }
  0x35   :  { %s949_s29 = smov [#allocation7]   ;;  %s950_s11 = smov [#allocation10]  }
  0x36   :  { %s49_s30 = sshll.u32 %s949_s29, 4  ;;  %s77_s12 = sshll.u32 %s950_s11, 4  ;;  %s50_s30 = int_to_ptr.vmem [resolvable:$true] %s49_s30  ;;  %s78_s12 = int_to_ptr.vmem [resolvable:$true] %s77_s12 }
  0x37   :  { %s868_s10 = scalar_lea.hbm %s1146_s3, 1024 }
  0x38   :  { %p869_p10 = scmp.ne.s32.totalorder %s1146_s3, %s868_s10  ;;  %p872_p11 = scmp.lt.u32.totalorder %s868_s10, %s1146_s3 }
  0x3a   :  { %p874_p12 = pnand %p872_p11, %p869_p10 }
  0x3c   :  { %877 = shalt.err (!%p874_p12)
}
  0x3d   :  { %s878_s0 = scalar_lea.vmem %s50_s30, 1024  ;;  %p883_p0 = scmp.lt.s32.totalorder %s50_s30, %s50_s30 }
  0x3e   :  { %p879_p13 = scmp.ne.s32.totalorder %s50_s30, %s878_s0  ;;  %p884_p1 = scmp.lt.s32.totalorder %s878_s0, %s878_s0 }
  0x40   :  { %p885_p2 = por %p884_p1, %p883_p0 }
  0x42   :  { %p886_p3 = pnand %p885_p2, %p879_p13 }
  0x44   :  { %889 = shalt.err (!%p886_p3)
}
  0x45   :  { %55 = dma.hbm_to_vmem [thread:$0]  %s1146_s3, 1024, %s50_s30, [#allocation6], %s943_s19, %s943_s19, %s944_s20  }
  0x46   :  { %s890_s23 = scalar_lea.hbm %s1150_s7, 1024 }
  0x47   :  { %p891_p4 = scmp.ne.s32.totalorder %s1150_s7, %s890_s23  ;;  %p894_p5 = scmp.lt.u32.totalorder %s890_s23, %s1150_s7 }
  0x49   :  { %p896_p6 = pnand %p894_p5, %p891_p4 }
  0x4b   :  { %899 = shalt.err (!%p896_p6)
}
  0x4c   :  { %s900_s28 = scalar_lea.vmem %s78_s12, 1024  ;;  %p905_p8 = scmp.lt.s32.totalorder %s78_s12, %s78_s12 }
  0x4d   :  { %p901_p7 = scmp.ne.s32.totalorder %s78_s12, %s900_s28  ;;  %p906_p9 = scmp.lt.s32.totalorder %s900_s28, %s900_s28 }
  0x4f   :  { %p907_p10 = por %p906_p9, %p905_p8 }
  0x51   :  { %p908_p11 = pnand %p907_p10, %p901_p7 }
  0x53   :  { %911 = shalt.err (!%p908_p11)
}
  0x54   :  { %83 = dma.hbm_to_vmem [thread:$0]  %s1150_s7, 1024, %s78_s12, [#allocation9], %s943_s19, %s943_s19, %s944_s20  }
  0x55   :  { %934 = dma.done.wait [#allocation3], 256  }
  0x56   :  { %935 = vsyncadd [#allocation3], 4294967040 }
  0x57   :  { %936 = dma.done.wait [#allocation6], 2048  }
  0x58   :  { %937 = vsyncadd [#allocation6], 4294965248 }
  0x59   :  { %938 = dma.done.wait [#allocation9], 2048  }
  0x5a   :  { %939 = vsyncadd [#allocation9], 4294965248  ;;  %v951_v0 = vmov 0.0   ;;  %vm952_vm0 = vmmov 0   ;;  %v770_v1 = vld [vmem:[#allocation5] sm:$0xff]   ;;  %v771_v2 = vld [vmem:[#allocation5 + $0x8] sm:$0xff]  }
  0x5b   :  { %678 = vmatprep.subr.bf16.mxu0 %v951_v0  ;;  %694 = vmatprep.mubr.msk.bf16.mxu0 %vm952_vm0, %v951_v0  ;;  %v772_v3 = vld [vmem:[#allocation5 + $0x10] sm:$0xff]   ;;  %v778_v4 = vld [vmem:[#allocation7] sm:$0xff]   ;;  %v773_v5 = vld [vmem:[#allocation5 + $0x18] sm:$0xff]  }
  0x5c   :  { %698 = vmatprep.subr.bf16.mxu1 %v951_v0  ;;  %714 = vmatprep.mubr.msk.bf16.mxu1 %vm952_vm0, %v951_v0  ;;  %v779_v6 = vld [vmem:[#allocation7 + $0x8] sm:$0xff]   ;;  %v774_v7 = vld [vmem:[#allocation5 + $0x20] sm:$0xff]   ;;  %v780_v8 = vld [vmem:[#allocation7 + $0x10] sm:$0xff]  }
  0x5d   :  { %679 = vmatpush3.bf16.msra.mxu0 %v770_v1  ;;  %699 = vmatpush3.bf16.msra.mxu1 %v778_v4  ;;  %v775_v9 = vld [vmem:[#allocation5 + $0x28] sm:$0xff]   ;;  %v781_v10 = vld [vmem:[#allocation7 + $0x18] sm:$0xff]   ;;  %v776_v11 = vld [vmem:[#allocation5 + $0x30] sm:$0xff]  }
  0x5e   :  { %680 = vmatprep.subr.bf16.mxu0 %v951_v0  ;;  %700 = vmatprep.subr.bf16.mxu1 %v951_v0  ;;  %v782_v12 = vld [vmem:[#allocation7 + $0x20] sm:$0xff]   ;;  %v777_v13 = vld [vmem:[#allocation5 + $0x38] sm:$0xff]   ;;  %v102_v14 = vld [vmem:[#allocation2] sm:$0xff] }
  0x5f   :  { %v103_v15 = vld [vmem:[#allocation2 + $0x8] sm:$0xff]  ;;  %v783_v17 = vld [vmem:[#allocation7 + $0x28] sm:$0xff]   ;;  %v784_v18 = vld [vmem:[#allocation7 + $0x30] sm:$0xff]  }
  0x60   :  { %v104_v16 = vpack.c.bf16 %v103_v15, %v102_v14  ;;  %v785_v19 = vld [vmem:[#allocation7 + $0x38] sm:$0xff]   ;;  %v786_v20 = vld [vmem:[#allocation8] sm:$0xff]   ;;  %v787_v21 = vld [vmem:[#allocation8 + $0x8] sm:$0xff]  }
  0x61   :  { %681 = vmatpush3.bf16.msra.mxu0 %v771_v2  ;;  %701 = vmatpush3.bf16.msra.mxu1 %v779_v6  ;;  %v788_v22 = vld [vmem:[#allocation8 + $0x10] sm:$0xff]   ;;  %v789_v23 = vld [vmem:[#allocation8 + $0x18] sm:$0xff]   ;;  %v790_v24 = vld [vmem:[#allocation8 + $0x20] sm:$0xff]  }
  0x62   :  { %682 = vmatprep.subr.bf16.mxu0 %v951_v0  ;;  %702 = vmatprep.subr.bf16.mxu1 %v951_v0  ;;  %v597_v25 = vld [vmem:[%s1145_s2] ss:$0 sm:$0xff]  ;;  %v791_v37 = vld [vmem:[#allocation8 + $0x28] sm:$0xff]   ;;  %v793_v39 = vld [vmem:[#allocation8 + $0x38] sm:$0xff]  }
  0x63   :  { %v792_v38 = vld [vmem:[#allocation8 + $0x30] sm:$0xff]   ;;  %v794_v40 = vld [vmem:[#allocation10] sm:$0xff]   ;;  %v795_v41 = vld [vmem:[#allocation10 + $0x8] sm:$0xff]  }
  0x64   :  { %v796_v42 = vld [vmem:[#allocation10 + $0x10] sm:$0xff]   ;;  %v797_v43 = vld [vmem:[#allocation10 + $0x18] sm:$0xff]   ;;  %v798_v44 = vld [vmem:[#allocation10 + $0x20] sm:$0xff]  }
  0x65   :  { %683 = vmatpush3.bf16.msra.mxu0 %v772_v3  ;;  %703 = vmatpush3.bf16.msra.mxu1 %v780_v8  ;;  %v606_v45 = vld [vmem:[%s1147_s4] ss:$0 sm:$0xff]  ;;  %v799_v57 = vld [vmem:[#allocation10 + $0x28] sm:$0xff]   ;;  %v801_v59 = vld [vmem:[#allocation10 + $0x38] sm:$0xff]  }
  0x66   :  { %684 = vmatprep.subr.bf16.mxu0 %v951_v0  ;;  %704 = vmatprep.subr.bf16.mxu1 %v951_v0  ;;  %v800_v58 = vld [vmem:[#allocation10 + $0x30] sm:$0xff]  }
  0x67   :  { %v615_v60 = vld [vmem:[%s1149_s6] ss:$0 sm:$0xff]  ;;  %s953_s6 = smov [#allocation11]  }
  0x68   :  { %s583_s10 = sshll.u32 %s953_s6, 4  ;;  %s584_s10 = int_to_ptr.vmem [resolvable:$true] %s583_s10 }
  0x69   :  { %685 = vmatpush3.bf16.msra.mxu0 %v773_v5  ;;  %705 = vmatpush3.bf16.msra.mxu1 %v781_v10  ;;  %s912_s14 = scalar_lea.vmem %s584_s10, 128  ;;  %p917_p13 = scmp.lt.s32.totalorder %s584_s10, %s584_s10 }
  0x6a   :  { %686 = vmatprep.subr.bf16.mxu0 %v951_v0  ;;  %706 = vmatprep.subr.bf16.mxu1 %v951_v0  ;;  %p913_p12 = scmp.ne.s32.totalorder %s584_s10, %s912_s14  ;;  %p918_p0 = scmp.lt.s32.totalorder %s912_s14, %s912_s14 }
  0x6c   :  { %p919_p1 = por %p918_p0, %p917_p13 }
  0x6d   :  { %687 = vmatpush3.bf16.msra.mxu0 %v774_v7  ;;  %707 = vmatpush3.bf16.msra.mxu1 %v782_v12 }
  0x6e   :  { %688 = vmatprep.subr.bf16.mxu0 %v951_v0  ;;  %708 = vmatprep.subr.bf16.mxu1 %v951_v0  ;;  %p920_p2 = pnand %p919_p1, %p913_p12 }
  0x71   :  { %689 = vmatpush3.bf16.msra.mxu0 %v775_v9  ;;  %709 = vmatpush3.bf16.msra.mxu1 %v783_v17 }
  0x72   :  { %690 = vmatprep.subr.bf16.mxu0 %v951_v0  ;;  %710 = vmatprep.subr.bf16.mxu1 %v951_v0 }
  0x75   :  { %691 = vmatpush3.bf16.msra.mxu0 %v776_v11  ;;  %711 = vmatpush3.bf16.msra.mxu1 %v784_v18 }
  0x76   :  { %692 = vmatprep.subr.bf16.mxu0 %v951_v0  ;;  %712 = vmatprep.subr.bf16.mxu1 %v951_v0 }
  0x79   :  { %693 = vmatpush3.bf16.msra.mxu0 %v777_v13  ;;  %713 = vmatpush3.bf16.msra.mxu1 %v785_v19 }
  0x7a   :  { %718 = vmatprep.subr.bf16.mxu0 %v951_v0  ;;  %738 = vmatprep.subr.bf16.mxu1 %v951_v0 }
  0x7c   :  { %695 = vmatmul.mubr.bf16.vlgmr.msra.gmra.mrb[0].mxu0 %v104_v16 }
  0x7d   :  { %734 = vmatprep.mubr.msk.bf16.mxu0 %vm952_vm0, %v951_v0  ;;  %719 = vmatpush3.bf16.msra.mxu0 %v786_v20 }
  0x7e   :  { %720 = vmatprep.subr.bf16.mxu0 %v951_v0 }
  0x81   :  { %721 = vmatpush3.bf16.msra.mxu0 %v787_v21 }
  0x82   :  { %722 = vmatprep.subr.bf16.mxu0 %v951_v0 }
  0x85   :  { %723 = vmatpush3.bf16.msra.mxu0 %v788_v22 }
  0x86   :  { %724 = vmatprep.subr.bf16.mxu0 %v951_v0 }
  0x89   :  { %725 = vmatpush3.bf16.msra.mxu0 %v789_v23 }
  0x8a   :  { %726 = vmatprep.subr.bf16.mxu0 %v951_v0 }
  0x8d   :  { %727 = vmatpush3.bf16.msra.mxu0 %v790_v24 }
  0x8e   :  { %728 = vmatprep.subr.bf16.mxu0 %v951_v0 }
  0x91   :  { %729 = vmatpush3.bf16.msra.mxu0 %v791_v37 }
  0x92   :  { %730 = vmatprep.subr.bf16.mxu0 %v951_v0 }
  0x95   :  { %731 = vmatpush3.bf16.msra.mxu0 %v792_v38 }
  0x96   :  { %732 = vmatprep.subr.bf16.mxu0 %v951_v0 }
  0x99   :  { %733 = vmatpush3.bf16.msra.mxu0 %v793_v39 }
 0x14f   :  { %v210_v26 = vpop.f32.mrb[0].mxu0 }
 0x150   :  { %v211_v27 = vadd.f32 %v597_v25, %v210_v26  ;;  %v696_v28 = vpop.f32.mrb[1].mxu0 }
 0x151   :  { %v213_v29 = vpop.f32.mrb[2].mxu0 }
 0x152   :  { %v217_v30 = vmul.f32 0.01, %v211_v27  ;;  %v214_v31 = vadd.f32 %v597_v25, %v213_v29  ;;  %v697_v32 = vpop.f32.mrb[3].mxu0 }
 0x154   :  { %v218_v33 = vmul.f32 0.01, %v214_v31  ;;  %v219_v34 = vmax.f32 %v211_v27, %v217_v30 }
 0x156   :  { %v220_v35 = vmax.f32 %v214_v31, %v218_v33 }
 0x158   :  { %v221_v36 = vpack.c.bf16 %v220_v35, %v219_v34 }
 0x15a   :  { %715 = vmatmul.mubr.bf16.vlgmr.msra.gmra.mrb[0].mxu1 %v221_v36 }
 0x15b   :  { %754 = vmatprep.mubr.msk.bf16.mxu1 %vm952_vm0, %v951_v0  ;;  %739 = vmatpush3.bf16.msra.mxu1 %v794_v40 }
 0x15c   :  { %740 = vmatprep.subr.bf16.mxu1 %v951_v0 }
 0x15f   :  { %741 = vmatpush3.bf16.msra.mxu1 %v795_v41 }
 0x160   :  { %742 = vmatprep.subr.bf16.mxu1 %v951_v0 }
 0x163   :  { %743 = vmatpush3.bf16.msra.mxu1 %v796_v42 }
 0x164   :  { %744 = vmatprep.subr.bf16.mxu1 %v951_v0 }
 0x167   :  { %745 = vmatpush3.bf16.msra.mxu1 %v797_v43 }
 0x168   :  { %746 = vmatprep.subr.bf16.mxu1 %v951_v0 }
 0x16b   :  { %747 = vmatpush3.bf16.msra.mxu1 %v798_v44 }
 0x16c   :  { %748 = vmatprep.subr.bf16.mxu1 %v951_v0 }
 0x16f   :  { %749 = vmatpush3.bf16.msra.mxu1 %v799_v57 }
 0x170   :  { %750 = vmatprep.subr.bf16.mxu1 %v951_v0 }
 0x173   :  { %751 = vmatpush3.bf16.msra.mxu1 %v800_v58 }
 0x174   :  { %752 = vmatprep.subr.bf16.mxu1 %v951_v0  ;;  %v624_v0 = vld [vmem:[%s1151_s8] ss:$0 sm:$0xff] }
 0x177   :  { %753 = vmatpush3.bf16.msra.mxu1 %v801_v59 }
 0x22d   :  { %v327_v46 = vpop.f32.mrb[0].mxu1 }
 0x22e   :  { %v328_v47 = vadd.f32 %v606_v45, %v327_v46  ;;  %v716_v48 = vpop.f32.mrb[1].mxu1 }
 0x22f   :  { %v330_v49 = vpop.f32.mrb[2].mxu1 }
 0x230   :  { %v334_v50 = vmul.f32 0.01, %v328_v47  ;;  %v331_v51 = vadd.f32 %v606_v45, %v330_v49  ;;  %v717_v52 = vpop.f32.mrb[3].mxu1 }
 0x232   :  { %v335_v53 = vmul.f32 0.01, %v331_v51  ;;  %v336_v54 = vmax.f32 %v328_v47, %v334_v50 }
 0x234   :  { %v337_v55 = vmax.f32 %v331_v51, %v335_v53 }
 0x236   :  { %v338_v56 = vpack.c.bf16 %v337_v55, %v336_v54 }
 0x238   :  { %735 = vmatmul.mubr.bf16.vlgmr.msra.gmra.mrb[4].mxu0 %v338_v56 }
 0x30b   :  { %v444_v61 = vpop.f32.mrb[4].mxu0 }
 0x30c   :  { %v445_v62 = vadd.f32 %v615_v60, %v444_v61  ;;  %v736_v63 = vpop.f32.mrb[5].mxu0 }
 0x30d   :  { %v447_v1 = vpop.f32.mrb[6].mxu0 }
 0x30e   :  { %v451_v2 = vmul.f32 0.01, %v445_v62  ;;  %v448_v3 = vadd.f32 %v615_v60, %v447_v1  ;;  %v737_v4 = vpop.f32.mrb[7].mxu0 }
 0x310   :  { %v452_v5 = vmul.f32 0.01, %v448_v3  ;;  %v453_v6 = vmax.f32 %v445_v62, %v451_v2 }
 0x312   :  { %v454_v7 = vmax.f32 %v448_v3, %v452_v5 }
 0x314   :  { %v455_v8 = vpack.c.bf16 %v454_v7, %v453_v6 }
 0x316   :  { %755 = vmatmul.mubr.bf16.vlgmr.msra.gmra.mrb[4].mxu1 %v455_v8 }
 0x3e9   :  { %v561_v9 = vpop.f32.mrb[4].mxu1 }
 0x3ea   :  { %v756_v10 = vpop.f32.mrb[5].mxu1  ;;  %v562_v12 = vadd.f32 %v624_v0, %v561_v9 }
 0x3eb   :  { %v564_v11 = vpop.f32.mrb[6].mxu1 }
 0x3ec   :  { %v565_v13 = vadd.f32 %v624_v0, %v564_v11  ;;  %v757_v14 = vpop.f32.mrb[7].mxu1 }
 0x3ee   :  { %v640_v15 = vpack.c.bf16 %v565_v13, %v562_v12 }
 0x3f0   :  { %641 = vst [vmem:[#allocation11] sm:$0xff] %v640_v15  }
 0x3f1   :  { %923 = shalt.err (!%p920_p2)
}
 0x3f2   :  { %s924_s16 = scalar_lea.hbm %s1152_s9, 128 }
 0x3f3   :  { %p925_p3 = scmp.ne.s32.totalorder %s1152_s9, %s924_s16  ;;  %p928_p4 = scmp.lt.u32.totalorder %s924_s16, %s1152_s9 }
 0x3f5   :  { %p930_p5 = pnand %p928_p4, %p925_p3 }
 0x3f7   :  { %933 = shalt.err (!%p930_p5)
}
 0x3f8   :  { %589 = dma.vmem_to_hbm [thread:$0]  %s584_s10, 128, %s1152_s9, [#allocation4], %s943_s19, %s943_s19, %s944_s20  }
 0x3f9   :  { %940 = dma.done.wait [#allocation4], 128  }
 0x3fa   :  { %941 = vsyncadd [#allocation4], 4294967168 }
 0x3fb   :  { %593 = vsyncpa [#allocation3], 1 }
 0x3fc   :  { %594 = vsyncpa [#allocation6], 1 }
 0x3fd   :  { %595 = vsyncpa [#allocation9], 1 }
 0x3fe   :  { %596 = vsyncpa [#allocation4], 1 }

</bundles_post_ra>
